<compile_context>
chip_gen: v7x
topology: tpu7x:2x2x1
jax: 0.10.0
libtpu: 0.0.40
codegen_flags: <defaults>
</compile_context>

<pallas_src>
import jax
import jax.numpy as jnp
import numpy as np
from jax import lax
from jax.experimental import pallas as pl
from jax.experimental.pallas import tpu as pltpu

_LANE = 128


# --------------------------------------------------------------------------
# Small helpers
# --------------------------------------------------------------------------
def _round_up(x, m):
    return (x + m - 1) // m * m


def _vmem_capacity_bytes():
    """Physical VMEM of the attached chip (128 MiB v5e/v6e, 64 MiB/TC v7x)."""
    try:
        return int(getattr(pltpu.get_tpu_info(), "vmem_capacity_bytes", 64 << 20))
    except Exception:
        return 64 << 20          # conservative fallback (v7x-sized)


def _pad2(a, rows, cols):
    pr, pc = rows - a.shape[0], cols - a.shape[1]
    if pr or pc:
        a = jnp.pad(a, ((0, pr), (0, pc)))
    return a


def _multi_step_cap(f_pad128):
    """Largest lane tile that still leaves >= 2 (>= 4 for large F) grid steps.

    The F grid axis is "parallel"; keeping at least 2 steps lets it shard
    across both v7x TensorCores (harmless single-TC cost on v5e/v6e).
    """
    if f_pad128 >= 8 * _LANE:
        return max(_LANE, (f_pad128 // 4) // _LANE * _LANE)
    if f_pad128 >= 2 * _LANE:
        return max(_LANE, (f_pad128 // 2) // _LANE * _LANE)
    return f_pad128


def _pick_tile_f_single(n_rows, f_pad128, in_b, out_b, io_budget):
    """Lane tile for the single-pass kernel, or None if chunked-N is required.

    per_lane counts the double-buffered x / out blocks, the fused (2, tile)
    stats blocks (in + out, double-buffered) and ~2 live (N, tile) f32
    temporaries inside the body (x upcast and the centred batch xc).
    """
    per_lane = 2 * n_rows * (in_b + out_b) + 8 * n_rows + 32
    max_tile = (io_budget // per_lane) // _LANE * _LANE
    if max_tile < _LANE:
        return None                      # a single 128-lane block does not fit
    max_tile = min(max_tile, _multi_step_cap(f_pad128))
    return int(min(max_tile, f_pad128))


def _pick_tiles_chunked(n_rows, f_pad128, in_b, out_b, io_budget, row_block=None):
    """(lane tile, row chunk) for the 2-kernel chunked-N path."""
    tile_f = min(4 * _LANE, f_pad128)                 # >=512 lanes saturate HBM BW
    tile_f = min(tile_f, _multi_step_cap(f_pad128))
    per_elem = 2 * in_b + 2 * out_b + 12              # dbl-buffered x/out + ~3 f32 temps
    stats_bytes = 48 * tile_f                         # stats in/out (dbl-buf) + accumulator
    if row_block is None:
        r = max(8, ((io_budget - stats_bytes) // (per_elem * tile_f)) // 8 * 8)
    else:
        r = max(8, _round_up(int(row_block), 8))
    r = min(r, _round_up(n_rows, 8))
    return int(tile_f), int(r)


# --------------------------------------------------------------------------
# Single-pass kernel: whole batch resident per F tile.
# --------------------------------------------------------------------------
def _online_norm_kernel(scal_ref, x_ref, stats_ref, out_ref, new_stats_ref):
    # scal_ref (SMEM f32[5]): [eps, nb/nab, na/nab, na*nb/nab, 1/(nab-1) or 0]
    eps = scal_ref[0]
    r_b = scal_ref[1]        # nb / nab
    r_a = scal_ref[2]        # na / nab
    r_ab = scal_ref[3]       # na * nb / nab
    inv_nm1 = scal_ref[4]    # 1/(n'-1), or 0 when n' <= 1

    x = x_ref[...].astype(jnp.float32)              # (N, T) f32 temp (budgeted)
    xa = stats_ref[0:1, :]                          # running mean
    m2a = stats_ref[1:2, :]                         # running M2

    xb = jnp.mean(x, axis=0, keepdims=True)         # batch mean
    delta = xb - xa
    xab = xa + delta * r_b                          # stable=False update branch

    xc = x - xb                                     # centred batch, f32 temp (budgeted)
    m2b = jnp.sum(xc * xc, axis=0, keepdims=True)   # == x.var(0, unbiased=False) * nb
    m2ab = m2a + m2b + delta * delta * r_ab

    new_stats_ref[0:1, :] = xab
    new_stats_ref[1:2, :] = m2ab

    # std of the *updated* state; rsqrt only on the (1, T) row rides the EUP slot.
    inv_std = lax.rsqrt(m2ab * inv_nm1 + eps)
    # x - xab == xc + delta * (na/nab): reuse xc, saving one (N, T) subtract.
    out_ref[...] = ((xc + delta * r_a) * inv_std).astype(out_ref.dtype)


# --------------------------------------------------------------------------
# Chunked-N path: kernel A accumulates batch stats over row chunks,
# kernel B streams x again and normalizes with the updated stats.
# --------------------------------------------------------------------------
def _stats_chunk_kernel(scal_ref, nrows_ref, x_ref, stats_ref, new_stats_ref, acc_ref):
    # scal_ref (SMEM f32[2]): [nb/nab, na*nb/nab]; nrows_ref (SMEM i32[1]): [N]
    k = pl.program_id(1)
    rows = x_ref.shape[0]

    @pl.when(k == 0)
    def _init():
        acc_ref[...] = jnp.zeros_like(acc_ref)

    n_total = nrows_ref[0]                           # true (unpadded) batch size
    row0 = k * rows
    m_i = jnp.minimum(n_total - row0, rows)          # valid rows in this chunk (>= 1)
    m = m_i.astype(jnp.float32)

    rid = lax.broadcasted_iota(jnp.int32, x_ref.shape, 0)
    valid = (rid < m_i).astype(jnp.float32)          # masks row padding of the last chunk

    x = x_ref[...].astype(jnp.float32) * valid
    mean_c = jnp.sum(x, axis=0, keepdims=True) * (1.0 / m)
    d = (x - mean_c) * valid
    m2_c = jnp.sum(d * d, axis=0, keepdims=True)

    # Chan/Welford merge of this chunk into the running *batch* accumulator.
    c_n = row0.astype(jnp.float32)                   # rows merged so far
    tot = c_n + m
    mean_a = acc_ref[0:1, :]
    delta = mean_c - mean_a
    acc_ref[0:1, :] = mean_a + delta * (m / tot)
    acc_ref[1:2, :] = acc_ref[1:2, :] + m2_c + delta * delta * (c_n * m / tot)

    @pl.when(k == pl.num_programs(1) - 1)
    def _finalize():
        r_b = scal_ref[0]                            # nb / nab
        r_ab = scal_ref[1]                           # na * nb / nab
        xa = stats_ref[0:1, :]
        m2a = stats_ref[1:2, :]
        xb = acc_ref[0:1, :]
        delta2 = xb - xa
        new_stats_ref[0:1, :] = xa + delta2 * r_b
        new_stats_ref[1:2, :] = m2a + acc_ref[1:2, :] + delta2 * delta2 * r_ab


def _normalize_chunk_kernel(scal_ref, x_ref, stats_ref, out_ref):
    # scal_ref (SMEM f32[2]): [eps, 1/(n'-1) or 0]; stats_ref holds the UPDATED stats.
    eps = scal_ref[0]
    inv_nm1 = scal_ref[1]
    mean = stats_ref[0:1, :]
    inv_std = lax.rsqrt(stats_ref[1:2, :] * inv_nm1 + eps)
    out_ref[...] = ((x_ref[...].astype(jnp.float32) - mean) * inv_std).astype(out_ref.dtype)


# --------------------------------------------------------------------------
# Wrapper
# --------------------------------------------------------------------------
def online_normalization_forward(x, n, mean, m2, epsilon=1e-10, *,
                                 _force_chunked=False, _row_block=None):
    """Functional OnlineNormalizationLayer.forward (training mode, stable=False).

    x:    (N, *shape) float array (f32/bf16; upcast to f32 happens in-vreg)
    n:    python int (previous sample count; stands in for the torch.long buffer)
    mean: (*shape,) running mean buffer
    m2:   (*shape,) running M2 buffer
    Returns (out, new_n, new_mean, new_m2).
    """
    feat_shape = x.shape[1:]
    N = int(x.shape[0])
    F = int(np.prod(feat_shape)) if feat_shape else 1

    x2 = jnp.asarray(x).reshape(N, F)                # keep dtype (no extra HBM cast pass)
    stats = jnp.stack([jnp.asarray(mean, jnp.float32).reshape(F),
                       jnp.asarray(m2, jnp.float32).reshape(F)], axis=0)   # fused (2, F)

    out_dtype = x2.dtype
    in_b = jnp.dtype(x2.dtype).itemsize
    out_b = jnp.dtype(out_dtype).itemsize

    # Exact (float64) host-side update weights -> f32 SMEM scalars.
    na, nb = float(n), float(N)
    nab = na + nb
    r_b, r_a, r_ab = nb / nab, na / nab, na * nb / nab
    inv_nm1 = 1.0 / (nab - 1.0) if nab > 1.0 else 0.0

    # Generation-aware VMEM budget: ~1/2 of physical VMEM for blocks + temps
    # (64 MiB on v5e/v6e's 128 MiB VMEM, 32 MiB on v7x's 64 MiB per TensorCore).
    vmem_cap = _vmem_capacity_bytes()
    io_budget = vmem_cap // 2

    f_pad128 = _round_up(max(F, 1), _LANE)

    tile_f = None if _force_chunked else _pick_tile_f_single(
        N, f_pad128, in_b, out_b, io_budget)

    if tile_f is not None:
        # ------------------------- single pass -------------------------
        # Pad F up to a multiple of the chosen tile (no divisor constraint):
        # a few zero lanes are far cheaper than collapsing to 128-lane tiles.
        f_pad = _round_up(f_pad128, tile_f)
        x2p = _pad2(x2, N, f_pad)
        statsp = _pad2(stats, 2, f_pad)
        grid = (f_pad // tile_f,)

        scal = jnp.asarray([epsilon, r_b, r_a, r_ab, inv_nm1], dtype=jnp.float32)
        footprint = tile_f * (2 * N * (in_b + out_b) + 8 * N + 32)
        vmem_limit = int(min(vmem_cap * 7 // 8, max(footprint + (8 << 20), 24 << 20)))
        cost = pl.CostEstimate(
            flops=int(8 * N * f_pad + 12 * f_pad),
            transcendentals=int(f_pad),
            bytes_accessed=int(N * f_pad * (in_b + out_b) + 16 * f_pad))

        # (pipeline_mode=pl.Buffered(3) on x is a possible tail optimization once
        #  an xprof trace shows exposed DMA at this tile size; not enabled here.)
        out, new_stats = pl.pallas_call(
            _online_norm_kernel,
            grid=grid,
            out_shape=(jax.ShapeDtypeStruct((N, f_pad), out_dtype),
                       jax.ShapeDtypeStruct((2, f_pad), jnp.float32)),
            in_specs=[
                pl.BlockSpec(memory_space=pltpu.MemorySpace.SMEM),       # scalars
                pl.BlockSpec((N, tile_f), lambda j: (0, j)),             # x
                pl.BlockSpec((2, tile_f), lambda j: (0, j)),             # fused mean/M2
            ],
            out_specs=(
                pl.BlockSpec((N, tile_f), lambda j: (0, j)),
                pl.BlockSpec((2, tile_f), lambda j: (0, j)),
            ),
            compiler_params=pltpu.CompilerParams(
                dimension_semantics=("parallel",),
                vmem_limit_bytes=vmem_limit),
            cost_estimate=cost,
        )(scal, x2p, statsp)
    else:
        # --------------- chunked-N: two streamed passes -----------------
        tile_f, r = _pick_tiles_chunked(N, f_pad128, in_b, out_b, io_budget, _row_block)
        f_pad = _round_up(f_pad128, tile_f)
        n_pad = _round_up(N, r)
        x2p = _pad2(x2, n_pad, f_pad)
        statsp = _pad2(stats, 2, f_pad)
        nf, nn = f_pad // tile_f, n_pad // r

        footprint = r * tile_f * (2 * in_b + 2 * out_b + 12) + 48 * tile_f
        vmem_limit = int(min(vmem_cap * 7 // 8, max(footprint + (8 << 20), 24 << 20)))

        scal_a = jnp.asarray([r_b, r_ab], dtype=jnp.float32)
        n_arr = jnp.asarray([N], dtype=jnp.int32)
        cost_a = pl.CostEstimate(
            flops=int(10 * n_pad * f_pad),
            transcendentals=0,
            bytes_accessed=int(n_pad * f_pad * in_b + 16 * f_pad))

        new_stats = pl.pallas_call(
            _stats_chunk_kernel,
            grid=(nf, nn),
            out_shape=jax.ShapeDtypeStruct((2, f_pad), jnp.float32),
            in_specs=[
                pl.BlockSpec(memory_space=pltpu.MemorySpace.SMEM),       # f32 ratios
                pl.BlockSpec(memory_space=pltpu.MemorySpace.SMEM),       # int32 [N]
                pl.BlockSpec((r, tile_f), lambda i, k: (k, i)),          # x row chunk
                pl.BlockSpec((2, tile_f), lambda i, k: (0, i)),          # old stats
            ],
            out_specs=pl.BlockSpec((2, tile_f), lambda i, k: (0, i)),    # new stats
            scratch_shapes=[pltpu.VMEM((2, tile_f), jnp.float32)],
            compiler_params=pltpu.CompilerParams(
                dimension_semantics=("parallel", "arbitrary"),
                vmem_limit_bytes=vmem_limit),
            cost_estimate=cost_a,
        )(scal_a, n_arr, x2p, statsp)

        scal_b = jnp.asarray([epsilon, inv_nm1], dtype=jnp.float32)
        cost_b = pl.CostEstimate(
            flops=int(4 * n_pad * f_pad),
            transcendentals=int(nn * f_pad),
            bytes_accessed=int(n_pad * f_pad * (in_b + out_b) + 8 * f_pad))

        out = pl.pallas_call(
            _normalize_chunk_kernel,
            grid=(nf, nn),
            out_shape=jax.ShapeDtypeStruct((n_pad, f_pad), out_dtype),
            in_specs=[
                pl.BlockSpec(memory_space=pltpu.MemorySpace.SMEM),       # [eps, 1/(n'-1)]
                pl.BlockSpec((r, tile_f), lambda i, k: (k, i)),          # x row chunk
                pl.BlockSpec((2, tile_f), lambda i, k: (0, i)),          # updated stats
            ],
            out_specs=pl.BlockSpec((r, tile_f), lambda i, k: (k, i)),
            compiler_params=pltpu.CompilerParams(
                dimension_semantics=("parallel", "parallel"),
                vmem_limit_bytes=vmem_limit),
            cost_estimate=cost_b,
        )(scal_b, x2p, new_stats)

    out = out[:N, :F]
    new_stats = new_stats[:, :F]
    new_n = int(n) + N
    return (out.reshape(x.shape), new_n,
            new_stats[0].reshape(feat_shape), new_stats[1].reshape(feat_shape))


# --------------------------------------------------------------------------
# Pure-numpy reference of the PyTorch module (training mode, stable=False).
# --------------------------------------------------------------------------
def _reference_forward(x, n, mean, m2, eps):
    x = np.asarray(x, np.float64)
    mean = np.asarray(mean, np.float64)
    m2 = np.asarray(m2, np.float64)
    na = float(n)
    nb = x.shape[0]
    nab = na + nb
    xb = x.mean(axis=0)
    delta = xb - mean
    xab = mean + delta * nb / nab
    m2b = x.var(axis=0) * nb                         # unbiased=False
    m2ab = m2 + m2b + delta ** 2 * na * nb / nab
    n_new = int(n) + nb
    var = m2ab / (n_new - 1) if n_new > 1 else np.zeros_like(m2ab)
    std = np.sqrt(var + eps)
    return (x - xab) / std, n_new, xab, m2ab


if __name__ == "__main__":
    eps = 1e-10
    key = jax.random.PRNGKey(0)
    k1, k2, k3, k4, k5, k6, k7 = jax.random.split(key, 7)

    # --- Case 1: the module's actual config (shape=(32,)), two consecutive
    # training-mode calls starting from fresh buffers (n=0, mean=0, M2=0). ---
    shape1, batch1 = (32,), 8
    xa1 = jax.random.normal(k1, (batch1,) + shape1, dtype=jnp.float32) * 2.0 + 1.0
    xa2 = jax.random.normal(k2, (batch1,) + shape1, dtype=jnp.float32) * 0.5 - 3.0

    n = 0
    mean = jnp.zeros(shape1, jnp.float32)
    m2 = jnp.zeros(shape1, jnp.float32)
    out1, n, mean, m2 = online_normalization_forward(xa1, n, mean, m2, eps)
    out2, n, mean, m2 = online_normalization_forward(xa2, n, mean, m2, eps)
    jax.block_until_ready((out1, out2, mean, m2))

    r_out1, r_n, r_mean, r_m2 = _reference_forward(
        xa1, 0, np.zeros(shape1), np.zeros(shape1), eps)
    r_out2, r_n, r_mean, r_m2 = _reference_forward(xa2, r_n, r_mean, r_m2, eps)
    np.testing.assert_allclose(np.asarray(out1), r_out1, rtol=1e-4, atol=1e-5)
    np.testing.assert_allclose(np.asarray(out2), r_out2, rtol=1e-4, atol=1e-5)
    np.testing.assert_allclose(np.asarray(mean), r_mean, rtol=1e-4, atol=1e-5)
    np.testing.assert_allclose(np.asarray(m2), r_m2, rtol=1e-4, atol=1e-4)
    assert n == r_n == 2 * batch1

    # --- Case 2: multi-dim feature shape, F=300 (not a multiple of 128 -> pad
    # to 384, 3 lane tiles) with nonzero prior statistics; single-pass path. ---
    shape2, batch2 = (3, 100), 16
    x2_ = jax.random.normal(k3, (batch2,) + shape2, dtype=jnp.float32) * 1.5 + 0.3
    n2 = 5
    mean2 = jax.random.normal(k4, shape2, dtype=jnp.float32)
    m2_2 = jnp.abs(jax.random.normal(k5, shape2, dtype=jnp.float32)) * 4.0 + 1.0
    o2, n2o, mean2o, m2_2o = online_normalization_forward(x2_, n2, mean2, m2_2, eps)
    jax.block_until_ready((o2, mean2o, m2_2o))
    r_o2, r_n2, r_mean2, r_m22 = _reference_forward(x2_, n2, mean2, m2_2, eps)
    np.testing.assert_allclose(np.asarray(o2), r_o2, rtol=1e-4, atol=1e-5)
    np.testing.assert_allclose(np.asarray(mean2o), r_mean2, rtol=1e-4, atol=1e-5)
    np.testing.assert_allclose(np.asarray(m2_2o), r_m22, rtol=1e-4, atol=1e-4)
    assert n2o == r_n2

    # --- Case 3: force the chunked-N (two-pass) path with a partial last row
    # chunk (batch=22, row block=8 -> 3 chunks, last one row-masked). ---
    shape3, batch3 = (160,), 22
    x3_ = jax.random.normal(k6, (batch3,) + shape3, dtype=jnp.float32) * 0.7 - 1.2
    n3 = 7
    mean3 = jax.random.normal(k7, shape3, dtype=jnp.float32) * 0.2
    m2_3 = jnp.abs(jax.random.normal(k1, shape3, dtype=jnp.float32)) * 3.0 + 0.5
    o3, n3o, mean3o, m2_3o = online_normalization_forward(
        x3_, n3, mean3, m2_3, eps, _force_chunked=True, _row_block=8)
    jax.block_until_ready((o3, mean3o, m2_3o))
    r_o3, r_n3, r_mean3, r_m23 = _reference_forward(x3_, n3, mean3, m2_3, eps)
    np.testing.assert_allclose(np.asarray(o3), r_o3, rtol=1e-4, atol=1e-5)
    np.testing.assert_allclose(np.asarray(mean3o), r_mean3, rtol=1e-4, atol=1e-5)
    np.testing.assert_allclose(np.asarray(m2_3o), r_m23, rtol=1e-4, atol=1e-4)
    assert n3o == r_n3

    print("KERNEL_OK")
</pallas_src>

<mosaic_0001>
module attributes {stable_mosaic.version = 11 : i64} {
  func.func @_online_norm_kernel(%arg0: i32, %arg1: memref<5xf32, #tpu.memory_space<smem>>, %arg2: memref<8x128xf32, #tpu.memory_space<vmem>>, %arg3: memref<2x128xf32, #tpu.memory_space<vmem>>, %arg4: memref<8x128xf32, #tpu.memory_space<vmem>>, %arg5: memref<2x128xf32, #tpu.memory_space<vmem>>) attributes {dimension_semantics = [#tpu.dimension_semantics<parallel>], iteration_bounds = array<i64: 1>, scalar_prefetch = 0 : i64, scratch_operands = 0 : i64, tpu.core_type = #tpu.core_type<tc>, window_params = [{transform_indices = @transform_0, window_bounds = array<i64: 5>}, {transform_indices = @transform_1, window_bounds = array<i64: 8, 128>}, {transform_indices = @transform_2, window_bounds = array<i64: 2, 128>}, {transform_indices = @transform_3, window_bounds = array<i64: 8, 128>}, {transform_indices = @transform_4, window_bounds = array<i64: 2, 128>}]} {
    %c0 = arith.constant 0 : index
    %0 = memref.load %arg1[%c0] : memref<5xf32, #tpu.memory_space<smem>>
    %c1 = arith.constant 1 : index
    %1 = memref.load %arg1[%c1] : memref<5xf32, #tpu.memory_space<smem>>
    %c2 = arith.constant 2 : index
    %2 = memref.load %arg1[%c2] : memref<5xf32, #tpu.memory_space<smem>>
    %c3 = arith.constant 3 : index
    %3 = memref.load %arg1[%c3] : memref<5xf32, #tpu.memory_space<smem>>
    %c4 = arith.constant 4 : index
    %4 = memref.load %arg1[%c4] : memref<5xf32, #tpu.memory_space<smem>>
    %c0_0 = arith.constant 0 : index
    %c0_1 = arith.constant 0 : index
    %5 = vector.load %arg2[%c0_0, %c0_1] : memref<8x128xf32, #tpu.memory_space<vmem>>, vector<8x128xf32>
    %c0_2 = arith.constant 0 : index
    %c0_3 = arith.constant 0 : index
    %6 = vector.load %arg3[%c0_2, %c0_3] : memref<2x128xf32, #tpu.memory_space<vmem>>, vector<1x128xf32>
    %c1_4 = arith.constant 1 : index
    %c0_5 = arith.constant 0 : index
    %7 = vector.load %arg3[%c1_4, %c0_5] : memref<2x128xf32, #tpu.memory_space<vmem>>, vector<1x128xf32>
    %cst = arith.constant dense<0.000000e+00> : vector<128xf32>
    %8 = vector.multi_reduction <add>, %5, %cst [0] : vector<8x128xf32> to vector<128xf32>
    %9 = vector.shape_cast %8 : vector<128xf32> to vector<1x128xf32>
    %cst_6 = arith.constant 8.000000e+00 : f32
    %10 = vector.broadcast %cst_6 : f32 to vector<1x128xf32>
    %11 = arith.divf %9, %10 : vector<1x128xf32>
    %12 = arith.subf %11, %6 : vector<1x128xf32>
    %13 = vector.broadcast %1 : f32 to vector<1x128xf32>
    %14 = arith.mulf %12, %13 : vector<1x128xf32>
    %15 = arith.addf %6, %14 : vector<1x128xf32>
    %16 = vector.broadcast %11 : vector<1x128xf32> to vector<8x128xf32>
    %17 = arith.subf %5, %16 : vector<8x128xf32>
    %18 = arith.mulf %17, %17 : vector<8x128xf32>
    %cst_7 = arith.constant dense<0.000000e+00> : vector<128xf32>
    %19 = vector.multi_reduction <add>, %18, %cst_7 [0] : vector<8x128xf32> to vector<128xf32>
    %20 = vector.shape_cast %19 : vector<128xf32> to vector<1x128xf32>
    %21 = arith.addf %7, %20 : vector<1x128xf32>
    %22 = arith.mulf %12, %12 : vector<1x128xf32>
    %23 = vector.broadcast %3 : f32 to vector<1x128xf32>
    %24 = arith.mulf %22, %23 : vector<1x128xf32>
    %25 = arith.addf %21, %24 : vector<1x128xf32>
    %c0_8 = arith.constant 0 : index
    %c0_9 = arith.constant 0 : index
    %26 = vector.load %arg5[%c0_8, %c0_9] : memref<2x128xf32, #tpu.memory_space<vmem>>, vector<1x128xf32>
    tpu.vector_store %arg5[%c0_8, %c0_9], %15 {strides = array<i32>} : memref<2x128xf32, #tpu.memory_space<vmem>>, vector<1x128xf32>,
    %c1_10 = arith.constant 1 : index
    %c0_11 = arith.constant 0 : index
    %27 = vector.load %arg5[%c1_10, %c0_11] : memref<2x128xf32, #tpu.memory_space<vmem>>, vector<1x128xf32>
    tpu.vector_store %arg5[%c1_10, %c0_11], %25 {strides = array<i32>} : memref<2x128xf32, #tpu.memory_space<vmem>>, vector<1x128xf32>,
    %28 = vector.broadcast %4 : f32 to vector<1x128xf32>
    %29 = arith.mulf %25, %28 : vector<1x128xf32>
    %30 = vector.broadcast %0 : f32 to vector<1x128xf32>
    %31 = arith.addf %29, %30 : vector<1x128xf32>
    %32 = math.rsqrt %31 : vector<1x128xf32>
    %33 = vector.broadcast %2 : f32 to vector<1x128xf32>
    %34 = arith.mulf %12, %33 : vector<1x128xf32>
    %35 = vector.broadcast %34 : vector<1x128xf32> to vector<8x128xf32>
    %36 = arith.addf %17, %35 : vector<8x128xf32>
    %37 = vector.broadcast %32 : vector<1x128xf32> to vector<8x128xf32>
    %38 = arith.mulf %36, %37 : vector<8x128xf32>
    %c0_12 = arith.constant 0 : index
    %c0_13 = arith.constant 0 : index
    %39 = vector.load %arg4[%c0_12, %c0_13] : memref<8x128xf32, #tpu.memory_space<vmem>>, vector<8x128xf32>
    tpu.vector_store %arg4[%c0_12, %c0_13], %38 {strides = array<i32>} : memref<8x128xf32, #tpu.memory_space<vmem>>, vector<8x128xf32>,
    return
  }
  func.func @transform_0(%arg0: i32) -> i32 {
    %c0_i32 = arith.constant 0 : i32
    %c0_i32_0 = arith.constant 0 : i32
    return %c0_i32 : i32
  }
  func.func @transform_1(%arg0: i32) -> (i32, i32) {
    %c0_i32 = arith.constant 0 : i32
    %c0_i32_0 = arith.constant 0 : i32
    return %c0_i32, %arg0 : i32, i32
  }
  func.func @transform_2(%arg0: i32) -> (i32, i32) {
    %c0_i32 = arith.constant 0 : i32
    %c0_i32_0 = arith.constant 0 : i32
    return %c0_i32, %arg0 : i32, i32
  }
  func.func @transform_3(%arg0: i32) -> (i32, i32) {
    %c0_i32 = arith.constant 0 : i32
    %c0_i32_0 = arith.constant 0 : i32
    return %c0_i32, %arg0 : i32, i32
  }
  func.func @transform_4(%arg0: i32) -> (i32, i32) {
    %c0_i32 = arith.constant 0 : i32
    %c0_i32_0 = arith.constant 0 : i32
    return %c0_i32, %arg0 : i32, i32
  }
}

</mosaic_0001>

<bundles_post_ra>
// kernel: tpu_custom_call.1
= control target key start
LH: loop header
LB: loop body
LE: loop exit
PB: predicated region body
PF: predicated region fallthrough
CT: control target
= control target key end

     0   :  { %10 = vsyncpa [#allocation5], 0  ;;  %s304_s0 = inlined_call_operand.hbm [shape: f32[5], index: 0, kind: input, shape index: {}]   ;;  %s305_s1 = inlined_call_operand.hbm [shape: f32[8,128], index: 1, kind: input, shape index: {}]   ;;  %s306_s2 = inlined_call_operand.vmem [shape: f32[2,128], index: 2, kind: input, shape index: {}]   ;;  %s307_s3 = inlined_call_operand.hbm [shape: f32[8,128], index: 3, kind: output, shape index: {0}]   ;;  %s308_s4 = inlined_call_operand.hbm [shape: f32[2,128], index: 4, kind: output, shape index: {1}]  }
   0x1   :  { %11 = vsyncpa [#allocation3], 0 }
   0x2   :  { %12 = vsyncpa [#allocation4], 0 }
   0x3   :  { %13 = vsyncpa [#allocation9], 0  ;;  %s134_s17 = scalar_lea.hbm %s304_s0, 16 }
   0x4   :  { %p135_p0 = scmp.ne.s32.totalorder %s304_s0, %s134_s17  ;;  %p138_p1 = scmp.lt.u32.totalorder %s134_s17, %s304_s0 }
   0x6   :  { %p140_p2 = pnand %p138_p1, %p135_p0 }
   0x8   :  { %143 = shalt.err (!%p140_p2)
}
   0x9   :  { %s218_s22 = smov [#allocation2]   ;;  %s219_s25 = smov [#allocation6]  }
   0xa   :  { %21 = dma.hbm_to_smem %s304_s0, 16, %s218_s22, [#allocation5]  }
   0xb   :  { %s28_s26 = sshll.u32 %s219_s25, 4  ;;  %s144_s29 = scalar_lea.hbm %s305_s1, 128  ;;  %s29_s26 = int_to_ptr.vmem [resolvable:$true] %s28_s26 }
   0xc   :  { %p145_p3 = scmp.ne.s32.totalorder %s305_s1, %s144_s29  ;;  %p148_p4 = scmp.lt.u32.totalorder %s144_s29, %s305_s1 }
   0xe   :  { %p150_p5 = pnand %p148_p4, %p145_p3 }
  0x10   :  { %153 = shalt.err (!%p150_p5)
}
  0x11   :  { %s154_s8 = scalar_lea.vmem %s29_s26, 128  ;;  %p159_p7 = scmp.lt.s32.totalorder %s29_s26, %s29_s26 }
  0x12   :  { %p155_p6 = scmp.ne.s32.totalorder %s29_s26, %s154_s8  ;;  %p160_p8 = scmp.lt.s32.totalorder %s154_s8, %s154_s8 }
  0x14   :  { %p161_p9 = por %p160_p8, %p159_p7 }
  0x16   :  { %p162_p10 = pnand %p161_p9, %p155_p6 }
  0x18   :  { %165 = shalt.err (!%p162_p10)
}
  0x19   :  { %31 = dma.hbm_to_vmem [thread:$0]  %s305_s1, 128, %s29_s26, [#allocation3]  }
  0x1a   :  { %210 = dma.done.wait [#allocation5], 16  }
  0x1b   :  { %211 = vsyncadd [#allocation5], 4294967280 }
  0x1c   :  { %212 = dma.done.wait [#allocation3], 128  }
  0x1d   :  { %213 = vsyncadd [#allocation3], 4294967168 }
  0x1e   :  { %40 = sfence }
  0x1f   :  { %v46_v0 = vld [vmem:[#allocation6] sm:$0xff]  ;;  %s124_s10 = sld [smem:[#allocation2 + $0x1]]  ;;  %v47_v7 = vld [vmem:[%s306_s2] sm:$0x1]  ;;  %s126_s1 = sld [smem:[#allocation2 + $0x3]]  ;;  %v83_v27 = vlaneseq }
  0x20   :  { %v49_v1 = vrot.slane %v46_v0, 4  ;;  %s127_s13 = sld [smem:[#allocation2 + $0x4]]  ;;  %s274_s14 = sld [smem:[#allocation2]]  ;;  %v48_v22 = vld [vmem:[%s306_s2 + $0x1] sm:$0x1] }
  0x21   :  { %s125_s17 = sld [smem:[#allocation2 + $0x2]]  ;;  %s220_s18 = smov [#allocation8]   ;;  %v84_v31 = vshrl.u32 %v83_v27, 7 }
  0x22   :  { %v50_v2 = vadd.f32 %v49_v1, %v46_v0  ;;  %s110_s19 = sshll.u32 %s220_s18, 4  ;;  %s111_s19 = int_to_ptr.vmem [resolvable:$true] %s110_s19 }
  0x23   :  { %s166_s20 = scalar_lea.vmem %s111_s19, 32  ;;  %p171_p12 = scmp.lt.s32.totalorder %s111_s19, %s111_s19 }
  0x24   :  { %v51_v3 = vrot.slane %v50_v2, 2  ;;  %p167_p11 = scmp.ne.s32.totalorder %s111_s19, %s166_s20  ;;  %p172_p13 = scmp.lt.s32.totalorder %s166_s20, %s166_s20 }
  0x25   :  { %v58_v9 = vstv %s124_s10  ;;  %v71_v20 = vstv %s126_s1 }
  0x26   :  { %v52_v4 = vadd.f32 %v51_v3, %v50_v2  ;;  %v76_v26 = vstv %s127_s13  ;;  %v78_v29 = vstv %s274_s14  ;;  %p173_p0 = por %p172_p13, %p171_p12 }
  0x28   :  { %v53_v5 = vrot.slane %v52_v4, 1  ;;  %p174_p1 = pnand %p173_p0, %p167_p11 }
  0x2a   :  { %v54_v6 = vadd.f32 %v53_v5, %v52_v4 }
  0x2c   :  { %v56_v8 = vmul.f32 0.125, %v54_v6 }
  0x2e   :  { %v57_v10 = vsub.f32 %v56_v8, %v47_v7  ;;  %v61_v11 = vsub.f32 %v46_v0, %v56_v8 }
  0x30   :  { %v59_v12 = vmul.f32 %v58_v9, %v57_v10  ;;  %v62_v13 = vmul.f32 %v61_v11, %v61_v11  ;;  %v70_v19 = vmul.f32 %v57_v10, %v57_v10 }
  0x32   :  { %v60_v14 = vadd.f32 %v59_v12, %v47_v7  ;;  %v63_v15 = vrot.slane %v62_v13, 4  ;;  %v72_v24 = vmul.f32 %v71_v20, %v70_v19 }
  0x34   :  { %74 = vst [vmem:[#allocation8] sm:$0x1] %v60_v14  ;;  %v64_v16 = vadd.f32 %v63_v15, %v62_v13 }
  0x36   :  { %v65_v17 = vrot.slane %v64_v16, 2 }
  0x38   :  { %v66_v18 = vadd.f32 %v65_v17, %v64_v16 }
  0x3a   :  { %v67_v21 = vrot.slane %v66_v18, 1 }
  0x3c   :  { %v68_v23 = vadd.f32 %v67_v21, %v66_v18 }
  0x3e   :  { %v69_v25 = vadd.f32 %v68_v23, %v48_v22 }
  0x40   :  { %v73_v28 = vadd.f32 %v72_v24, %v69_v25 }
  0x42   :  { %75 = vst [vmem:[#allocation8 + $0x1] sm:$0x1] %v73_v28  ;;  %v77_v30 = vmul.f32 %v76_v26, %v73_v28 }
  0x43   :  { %177 = shalt.err (!%p174_p1)
}
  0x44   :  { %s178_s22 = scalar_lea.hbm %s308_s4, 32 }
  0x45   :  { %p179_p2 = scmp.ne.s32.totalorder %s308_s4, %s178_s22  ;;  %p182_p3 = scmp.lt.u32.totalorder %s178_s22, %s308_s4 }
  0x47   :  { %p184_p4 = pnand %p182_p3, %p179_p2 }
  0x49   :  { %187 = shalt.err (!%p184_p4)
}
  0x4a   :  { %113 = dma.vmem_to_hbm [thread:$0]  %s111_s19, 32, %s308_s4, [#allocation9]   ;;  %v79_v32 = vadd.f32 %v78_v29, %v77_v30  ;;  %v81_v33 = vstv %s125_s17  ;;  %v85_v35 = vsub.s32 0, %v84_v31 }
  0x4b   :  { %v82_v34 = vmul.f32 %v81_v33, %v57_v10  ;;  %s221_s29 = smov [#allocation7]  }
  0x4c   :  { %132 = vrsqrt.f32 %v79_v32  ;;  %s100_s30 = sshll.u32 %s221_s29, 4  ;;  %s101_s30 = int_to_ptr.vmem [resolvable:$true] %s100_s30 }
  0x4d   :  { %v86_v36 = vrot.slane %v82_v34, %v85_v35  ;;  %s188_s5 = scalar_lea.vmem %s101_s30, 128  ;;  %p193_p6 = scmp.lt.s32.totalorder %s101_s30, %s101_s30 }
  0x4e   :  { %p189_p5 = scmp.ne.s32.totalorder %s101_s30, %s188_s5  ;;  %p194_p7 = scmp.lt.s32.totalorder %s188_s5, %s188_s5 }
  0x4f   :  { %v87_v37 = vadd.f32 %v86_v36, %v61_v11 }
  0x50   :  { %p195_p8 = por %p194_p7, %p193_p6 }
  0x52   :  { %p196_p9 = pnand %p195_p8, %p189_p5 }
  0x56   :  { %v133_v38 = vpop.eup %132 }
  0x57   :  { %v91_v39 = vrot.slane %v133_v38, %v85_v35 }
  0x59   :  { %v92_v40 = vmul.f32 %v91_v39, %v87_v37 }
  0x5b   :  { %93 = vst [vmem:[#allocation7] sm:$0xff] %v92_v40 }
  0x5c   :  { %199 = shalt.err (!%p196_p9)
}
  0x5d   :  { %s200_s7 = scalar_lea.hbm %s307_s3, 128 }
  0x5e   :  { %p201_p10 = scmp.ne.s32.totalorder %s307_s3, %s200_s7  ;;  %p204_p11 = scmp.lt.u32.totalorder %s200_s7, %s307_s3 }
  0x60   :  { %p206_p12 = pnand %p204_p11, %p201_p10 }
  0x62   :  { %209 = shalt.err (!%p206_p12)
}
  0x63   :  { %103 = dma.vmem_to_hbm [thread:$0]  %s101_s30, 128, %s307_s3, [#allocation4]  }
  0x64   :  { %214 = dma.done.wait [#allocation4], 128  }
  0x65   :  { %215 = vsyncadd [#allocation4], 4294967168 }
  0x66   :  { %216 = dma.done.wait [#allocation9], 32  }
  0x67   :  { %217 = vsyncadd [#allocation9], 4294967264 }
  0x68   :  { %120 = vsyncpa [#allocation3], 1 }
  0x69   :  { %121 = vsyncpa [#allocation4], 1 }
  0x6a   :  { %122 = vsyncpa [#allocation9], 1 }
  0x6b   :  { %123 = vsyncpa [#allocation5], 1 }

</bundles_post_ra>
